<compile_context>
chip_gen: v6e
topology: v6e:2x2x1
jax: 0.10.0
libtpu: 0.0.40
codegen_flags: <defaults>
</compile_context>

<pallas_src>
import functools

import jax
import jax.numpy as jnp
import numpy as np
from jax import lax
from jax.experimental import pallas as pl
from jax.experimental.pallas import tpu as pltpu


def _cosface_single_k_kernel(emb_ref, w_ref, lab_ref, out_ref, *, m, s, tn):
    """Whole-E tile per program: fused matmul + column norm + margin + scale."""
    col0 = pl.program_id(1) * tn  # grid scalars stay at the top level

    w = w_ref[...]                                           # (E, tn) compute dtype
    # Column inverse L2 norm from the already-resident W tile (no extra HBM
    # pass over W). Squares / sum in f32; rsqrt runs on the EUP slot.
    w32 = w.astype(jnp.float32)
    inv_norm = lax.rsqrt(jnp.sum(w32 * w32, axis=0, keepdims=True))  # (1, tn)

    # emb @ W on the MXU with f32 accumulation; apply 1/||W_col|| afterwards
    # (mathematically identical to normalizing W first).
    cos = jnp.dot(emb_ref[...], w, preferred_element_type=jnp.float32)
    cos = jnp.clip(cos * inv_norm, -1.0, 1.0)

    # Subtract the margin at each row's label column, then scale by s.
    col_ids = col0 + lax.broadcasted_iota(jnp.int32, cos.shape, 1)
    is_label = lab_ref[...] == col_ids                       # (tm,1) vs (tm,tn)
    out_ref[...] = (jnp.where(is_label, cos - m, cos) * s).astype(out_ref.dtype)


def _cosface_multi_k_kernel(emb_ref, w_ref, inv_norm_ref, lab_ref, out_ref,
                            *, m, s, tn):
    """Fallback when E does not fit one block: accumulate over K into out_ref."""
    # Grid scalars hoisted to the top level (never inside pl.when bodies).
    k = pl.program_id(2)
    k_last = pl.num_programs(2) - 1
    col0 = pl.program_id(1) * tn

    @pl.when(k == 0)
    def _():
        out_ref[...] = jnp.zeros_like(out_ref)

    # Accumulate directly into the f32 output block (resident across k):
    # no separate scratch accumulator, no extra full-tile copy.
    out_ref[...] += jnp.dot(emb_ref[...], w_ref[...],
                            preferred_element_type=jnp.float32)

    @pl.when(k == k_last)
    def _():
        cos = jnp.clip(out_ref[...] * inv_norm_ref[...], -1.0, 1.0)
        col_ids = col0 + lax.broadcasted_iota(jnp.int32, cos.shape, 1)
        is_label = lab_ref[...] == col_ids
        out_ref[...] = (jnp.where(is_label, cos - m, cos) * s).astype(
            out_ref.dtype)


def _pick_tile(dim, preferred, align):
    """Largest `align`-aligned tile <= preferred that divides dim.

    A tile equal to the full dim is always legal, so fall back to that.
    """
    if dim <= preferred:
        return dim
    t = (min(preferred, dim) // align) * align
    while t >= align:
        if dim % t == 0:
            return t
        t -= align
    return dim


def _choose_tiles(B, E, C, itemsize, vmem_budget_bytes):
    # K: collapse to a single block whenever the embedding dim is head-sized.
    tk = E if E <= 2048 else _pick_tile(E, 1024, 128)

    # N: lane-dense (multiple of 128); keep >= 2 column tiles when possible so
    # the parallel class axis can split across v7x's two TensorCores.
    tn = _pick_tile(C, 512, 128)
    if C // tn == 1 and C % 256 == 0 and C > 128:
        tn = C // 2

    # M: as large as the double-buffered working set allows, so the weight
    # matrix is streamed from HBM as few times (ideally once) as possible.
    sub = 16 if itemsize == 2 else 8
    fixed = 2 * tk * tn * itemsize                      # W tiles (x2 buffers)
    per_row = 2 * tk * itemsize + 2 * tn * 4            # emb + f32 out per row
    cap = max(sub, (vmem_budget_bytes - fixed) // per_row)
    tm = _pick_tile(B, int(cap), sub)
    return tm, tn, tk


def cosface_forward(embeddings, weight, labels, *, m=0.35, s=30.0,
                    compute_dtype=jnp.bfloat16, tm=None, tn=None, tk=None,
                    vmem_budget_bytes=36 * 1024 * 1024):
    B, E = embeddings.shape
    E2, C = weight.shape
    assert E == E2, "embedding dim mismatch"

    itemsize = jnp.dtype(compute_dtype).itemsize
    atm, atn, atk = _choose_tiles(B, E, C, itemsize, vmem_budget_bytes)
    tm = atm if tm is None else tm
    tn = atn if tn is None else tn
    tk = atk if tk is None else tk
    assert B % tm == 0 and C % tn == 0 and E % tk == 0, (tm, tn, tk)

    # Compute-dtype feed for the MXU / HBM streams; accumulation, the column
    # norm and the epilogue stay f32.
    emb_c = embeddings.astype(compute_dtype)
    w_c = weight.astype(compute_dtype)
    labels2d = labels.reshape(B, 1).astype(jnp.int32)

    # Double-buffered VMEM working-set estimate -> scoped limit, with a
    # conservative ceiling so it also fits v7x's 64 MiB physical VMEM.
    est = (2 * (tm * tk + tk * tn) * itemsize + 2 * tm * tn * 4
           + 2 * (tn + tm) * 4)
    vmem_limit = int(min(48 * 1024 * 1024,
                         max(32 * 1024 * 1024, est + (4 << 20))))

    if tk == E:
        # Single K block: fused column norm, no pl.when, fully-parallel 2-D grid.
        kernel = functools.partial(_cosface_single_k_kernel, m=m, s=s, tn=tn)
        grid = (B // tm, C // tn)
        in_specs = [
            pl.BlockSpec((tm, tk), lambda i, j: (i, 0)),   # embeddings
            pl.BlockSpec((tk, tn), lambda i, j: (0, j)),   # weight
            pl.BlockSpec((tm, 1), lambda i, j: (i, 0)),    # labels
        ]
        out_specs = pl.BlockSpec((tm, tn), lambda i, j: (i, j))
        dim_sem = ("parallel", "parallel")
        operands = (emb_c, w_c, labels2d)
    else:
        # Large-E fallback: one wrapper pass over the same compute-dtype W the
        # MXU sees for the column norm; accumulate into the f32 output block.
        w32 = w_c.astype(jnp.float32)
        inv_norm = lax.rsqrt(jnp.sum(w32 * w32, axis=0, keepdims=True))  # (1,C)
        kernel = functools.partial(_cosface_multi_k_kernel, m=m, s=s, tn=tn)
        grid = (B // tm, C // tn, E // tk)
        in_specs = [
            pl.BlockSpec((tm, tk), lambda i, j, k: (i, k)),   # embeddings
            pl.BlockSpec((tk, tn), lambda i, j, k: (k, j)),   # weight
            pl.BlockSpec((1, tn), lambda i, j, k: (0, j)),    # 1/||W_col||
            pl.BlockSpec((tm, 1), lambda i, j, k: (i, 0)),    # labels
        ]
        out_specs = pl.BlockSpec((tm, tn), lambda i, j, k: (i, j))
        dim_sem = ("parallel", "parallel", "arbitrary")
        operands = (emb_c, w_c, inv_norm, labels2d)

    return pl.pallas_call(
        kernel,
        out_shape=jax.ShapeDtypeStruct((B, C), jnp.float32),
        grid_spec=pltpu.PrefetchScalarGridSpec(
            num_scalar_prefetch=0,
            grid=grid,
            in_specs=in_specs,
            out_specs=out_specs,
        ),
        compiler_params=pltpu.CompilerParams(
            dimension_semantics=dim_sem,
            vmem_limit_bytes=vmem_limit),
    )(*operands)


def cosface_reference(embeddings, weight, labels, *, m=0.35, s=30.0,
                      compute_dtype=jnp.bfloat16):
    # Same compute-dtype rounding of the inputs as the kernel; math in f32.
    e = embeddings.astype(compute_dtype).astype(jnp.float32)
    w = weight.astype(compute_dtype).astype(jnp.float32)
    kernel_norm = w / jnp.linalg.norm(w, axis=0, keepdims=True)
    cos = jnp.clip(jnp.dot(e, kernel_norm, precision=lax.Precision.HIGHEST),
                   -1.0, 1.0)
    one_hot = jax.nn.one_hot(labels, weight.shape[1], dtype=jnp.bool_)
    return jnp.where(one_hot, cos - m, cos) * s


if __name__ == "__main__":
    # Small shapes consistent with the module (embedding_size=E, classnum=C).
    B, E, C = 16, 256, 1024

    key = jax.random.PRNGKey(0)
    k_emb, k_w, k_lab = jax.random.split(key, 3)

    embeddings = jax.random.normal(k_emb, (B, E), dtype=jnp.float32)
    # The PyTorch uniform_/renorm_/mul_ only shapes the *initial* weight; the
    # forward pass re-normalizes columns every call, so a plain uniform weight
    # is an equivalent test input.
    weight = jax.random.uniform(k_w, (E, C), dtype=jnp.float32,
                                minval=-1.0, maxval=1.0)
    labels = jax.random.randint(k_lab, (B,), 0, C, dtype=jnp.int32)

    out = cosface_forward(embeddings, weight, labels)
    out = jax.block_until_ready(out)

    ref = cosface_reference(embeddings, weight, labels)
    np.testing.assert_allclose(np.asarray(out), np.asarray(ref),
                               rtol=2e-3, atol=2e-3)

    print("KERNEL_OK")
</pallas_src>

<mosaic_0001>
module attributes {stable_mosaic.version = 11 : i64} {
  func.func @_cosface_single_k_kernel(%arg0: i32, %arg1: i32, %arg2: memref<16x256xbf16, #tpu.memory_space<vmem>>, %arg3: memref<256x512xbf16, #tpu.memory_space<vmem>>, %arg4: memref<16x1xi32, #tpu.memory_space<vmem>>, %arg5: memref<16x512xf32, #tpu.memory_space<vmem>>) attributes {dimension_semantics = [#tpu.dimension_semantics<parallel>, #tpu.dimension_semantics<parallel>], iteration_bounds = array<i64: 1, 2>, scalar_prefetch = 0 : i64, scratch_operands = 0 : i64, tpu.core_type = #tpu.core_type<tc>, window_params = [{transform_indices = @transform_0, window_bounds = array<i64: 16, 256>}, {transform_indices = @transform_1, window_bounds = array<i64: 256, 512>}, {transform_indices = @transform_2, window_bounds = array<i64: 16, 1>}, {transform_indices = @transform_3, window_bounds = array<i64: 16, 512>}]} {
    %c512_i32 = arith.constant 512 : i32
    %0 = arith.muli %arg1, %c512_i32 : i32
    %c0 = arith.constant 0 : index
    %c0_0 = arith.constant 0 : index
    %1 = vector.load %arg3[%c0, %c0_0] : memref<256x512xbf16, #tpu.memory_space<vmem>>, vector<256x512xbf16>
    %2 = arith.extf %1 : vector<256x512xbf16> to vector<256x512xf32>
    %3 = arith.mulf %2, %2 : vector<256x512xf32>
    %cst = arith.constant dense<0.000000e+00> : vector<512xf32>
    %4 = vector.multi_reduction <add>, %3, %cst [0] : vector<256x512xf32> to vector<512xf32>
    %5 = vector.shape_cast %4 : vector<512xf32> to vector<1x512xf32>
    %6 = math.rsqrt %5 : vector<1x512xf32>
    %c0_1 = arith.constant 0 : index
    %c0_2 = arith.constant 0 : index
    %7 = vector.load %arg2[%c0_1, %c0_2] : memref<16x256xbf16, #tpu.memory_space<vmem>>, vector<16x256xbf16>
    %cst_3 = arith.constant dense<0.000000e+00> : vector<16x512xf32>
    %8 = tpu.matmul %7, %1, %cst_3 {dimension_numbers = #tpu.dot_dimension_numbers<[1], [0], [0], [1], [0, 0, 1, 1], [], []>} : vector<16x256xbf16>, vector<256x512xbf16>, vector<16x512xf32> -> vector<16x512xf32>
    %9 = vector.broadcast %6 : vector<1x512xf32> to vector<16x512xf32>
    %10 = arith.mulf %8, %9 : vector<16x512xf32>
    %cst_4 = arith.constant -1.000000e+00 : f32
    %cst_5 = arith.constant 1.000000e+00 : f32
    %11 = vector.broadcast %cst_4 : f32 to vector<16x512xf32>
    %12 = arith.maximumf %11, %10 : vector<16x512xf32>
    %13 = vector.broadcast %cst_5 : f32 to vector<16x512xf32>
    %14 = arith.minimumf %13, %12 : vector<16x512xf32>
    %15 = tpu.iota {dimensions = array<i32: 1>} : vector<16x512xi32>
    %16 = vector.broadcast %0 : i32 to vector<16x512xi32>
    %17 = arith.addi %16, %15 : vector<16x512xi32>
    %c0_6 = arith.constant 0 : index
    %c0_7 = arith.constant 0 : index
    %18 = vector.load %arg4[%c0_6, %c0_7] : memref<16x1xi32, #tpu.memory_space<vmem>>, vector<16x1xi32>
    %19 = vector.broadcast %18 : vector<16x1xi32> to vector<16x512xi32>
    %20 = arith.cmpi eq, %19, %17 : vector<16x512xi32>
    %cst_8 = arith.constant 3.500000e-01 : f32
    %21 = vector.broadcast %cst_8 : f32 to vector<16x512xf32>
    %22 = arith.subf %14, %21 : vector<16x512xf32>
    %23 = arith.select %20, %22, %14 : vector<16x512xi1>, vector<16x512xf32>
    %cst_9 = arith.constant 3.000000e+01 : f32
    %24 = vector.broadcast %cst_9 : f32 to vector<16x512xf32>
    %25 = arith.mulf %23, %24 : vector<16x512xf32>
    %c0_10 = arith.constant 0 : index
    %c0_11 = arith.constant 0 : index
    %26 = vector.load %arg5[%c0_10, %c0_11] : memref<16x512xf32, #tpu.memory_space<vmem>>, vector<16x512xf32>
    tpu.vector_store %arg5[%c0_10, %c0_11], %25 {strides = array<i32>} : memref<16x512xf32, #tpu.memory_space<vmem>>, vector<16x512xf32>,
    return
  }
  func.func @transform_0(%arg0: i32, %arg1: i32) -> (i32, i32) {
    %c0_i32 = arith.constant 0 : i32
    %c0_i32_0 = arith.constant 0 : i32
    return %arg0, %c0_i32 : i32, i32
  }
  func.func @transform_1(%arg0: i32, %arg1: i32) -> (i32, i32) {
    %c0_i32 = arith.constant 0 : i32
    %c0_i32_0 = arith.constant 0 : i32
    return %c0_i32, %arg1 : i32, i32
  }
  func.func @transform_2(%arg0: i32, %arg1: i32) -> (i32, i32) {
    %c0_i32 = arith.constant 0 : i32
    %c0_i32_0 = arith.constant 0 : i32
    return %arg0, %c0_i32 : i32, i32
  }
  func.func @transform_3(%arg0: i32, %arg1: i32) -> (i32, i32) {
    %c0_i32 = arith.constant 0 : i32
    return %arg0, %arg1 : i32, i32
  }
}

</mosaic_0001>

<bundles_post_ra>
// kernel: tpu_custom_call.1
= control target key start
LH: loop header
LB: loop body
LE: loop exit
PB: predicated region body
PF: predicated region fallthrough
CT: control target
= control target key end

     0   :  { %8 = vsyncpa [#allocation3], 0  ;;  %s2312_s0 = inlined_call_operand.vmem [shape: bf16[16,256], index: 0, kind: input, shape index: {}]   ;;  %s2313_s1 = inlined_call_operand.hbm [shape: bf16[256,1024], index: 1, kind: input, shape index: {}]   ;;  %s2314_s2 = inlined_call_operand.vmem [shape: s32[16,1], index: 2, kind: input, shape index: {}]   ;;  %s2315_s3 = inlined_call_operand.hbm [shape: f32[16,1024], index: 3, kind: output, shape index: {}]  }
   0x1   :  { %10 = vsyncpa [#allocation3 + $0x1], 0 }
   0x2   :  { %11 = vsyncpa [#allocation4], 0 }
   0x3   :  { %13 = vsyncpa [#allocation4 + $0x1], 0  ;;  %s1840_s12 = smov 0   ;;  %s1842_s13 = smov 0  }
   0x4   :  { %s1844_s14 = smov 0   ;;  %s1846_s15 = smov 0  }
   0x5   :  { %s1848_s16 = smov 0   ;;  %s1850_s17 = smov 0  }
   0x6 LB: > { %s1357_s18 = sadd.s32 4294967295, %s1808_s17   ;;  %s1358_s19 = sadd.s32 4294967294, %s1808_s17   ;;  %s1808_s17 = sphi %s1850_s17, %s19_s17   ;;  %s1804_s16 = sphi %s1848_s16, %s2326_s16   ;;  %s1800_s15 = sphi %s1846_s15, %s2325_s15   ;;  %s1796_s14 = sphi %s1844_s14, %s2324_s14   ;;  %s1792_s13 = sphi %s1842_s13, %s2323_s13   ;;  %s1788_s12 = sphi %s1840_s12, %s2322_s12  }
   0x7   : > { %s28_s20 = sadd.s32 1, %s1804_s16  ;;  %s64_s21 = sadd.s32 1, %s1796_s14 }
   0x8   : > { %p29_p0 = scmp.ge.s32.totalorder %s28_s20, 2  ;;  %p71_p1 = scmp.ne.s32.totalorder %s1796_s14, %s1792_s13 }
   0x9   : > { %p72_p2 = scmp.eq.s32.totalorder %s1808_s17, 0  ;;  %p77_p3 = scmp.ne.s32.totalorder %s1792_s13, %s1788_s12 }
   0xa   : > { %s2328_s20 = smov (%p29_p0, %s28_s20), 0  ;;  %p78_p5 = scmp.eq.s32.totalorder %s1357_s18, 0 }
   0xb   : > { %p1881_p4 = por %p72_p2, %p71_p1  ;;  %s61_s23 = ssub.s32 %s1804_s16, %s2328_s20 }
   0xc   : > { %p129_p6 = scmp.eq.s32.totalorder %s1357_s18, 1  ;;  %p62_p7 = scmp.eq.s32.totalorder %s61_s23, 0 }
   0xd   : > { %p1887_p8 = por %p78_p5, %p77_p3  ;;  %p135_p10 = scmp.eq.s32.totalorder %s1358_s19, 1 }
   0xe   : > { %p1891_p9 = por %p129_p6, %p71_p1  ;;  %p1471_p13 = scmp.lt.s32.totalorder %s1808_s17, 2 }
   0xf   : > { %s1896_s26 = scalar_select %p62_p7, %s1796_s14, %s64_s21  }
  0x10   : > { %p1898_p11 = por %p135_p10, %p77_p3  ;;  %s174_s28 = sand.u32 1, %s1796_s14  }
  0x11   : > { %s1363_s29 = sshll.u32 %s174_s28, 9  ;;  %s1457_s30 = sshll.u32 %s1804_s16, 8 }
  0x12   : > { %s184_s6 = scalar_lea.hbm %s2313_s1, %s1457_s30  ;;  %s178_s7 = scalar_lea.vmem [#allocation2], %s1363_s29 }
  0x13   : > { %s185_s8 = sshll.u32 %s178_s7, 4  ;;  %p1911_p0 = pnand %p1471_p13, %p1881_p4  ;;  %s186_s8 = int_to_ptr.vmem [resolvable:$true] %s185_s8 }
  0x14   : > { %s175_s10 = scalar_lea.sflag [#allocation3], %s174_s28  ;;  %s1617_s11 = scalar_lea.vmem %s186_s8, 8192 }
  0x15   : > { %p1606_p1 = pneg %p1911_p0  ;;  %p1618_p2 = scmp.ne.s32.totalorder %s186_s8, %s1617_s11 }
  0x16   : > { %s1810_s18 = smov [#allocation2]  }
  0x17   : > { %p1620_p3 = pnand %p1618_p2, %p1606_p1  ;;  %s1622_s19 = sshll.u32 %s1810_s18, 4  ;;  %s1623_s19 = int_to_ptr.vmem [resolvable:$false] %s1622_s19 }
  0x18   : > { %s1624_s21 = scalar_lea.vmem %s1623_s19, 16384  ;;  %p1625_p6 = scmp.lt.s32.totalorder %s186_s8, %s1623_s19 }
  0x19   : > { %p1621_p5 = pneg %p1620_p3  ;;  %p1626_p7 = scmp.lt.s32.totalorder %s1624_s21, %s1617_s11 }
  0x1b   : > { %p1627_p10 = por %p1626_p7, %p1625_p6 }
  0x1d   : > { %p1628_p12 = pnand %p1627_p10, %p1621_p5 }
  0x1f   : > { %1631 = shalt.err (!%p1628_p12)
}
  0x20   : > { %s1811_s22 = smov 512   ;;  %s1812_s23 = smov 256  }
  0x21   : > { %s1813_s28 = smov 16   ;;  %p1366_p4 = scmp.ge.s32.totalorder %s1808_s17, 1 }
  0x22   : > { %1466 = dma.hbm_to_vmem [thread:$0]  (!%p1911_p0), %s184_s6, 8192, %s186_s8, %s175_s10, %s1811_s22, %s1812_s23, %s1813_s28  }
  0x23   : > { %p193_p13 = scmp.lt.s32.totalorder %s1808_s17, 3 }
  0x25   : > { %p194_p1 = pnand %p1366_p4, %p193_p13 }
  0x26   : > { %s1922_s29 = sand.u32 (!%p194_p1), 1, %s1792_s13  }
  0x27   : > { %197 = sbr.rel (%p194_p1) target bundleno = 336 (0x150), region = 32  ;;  %s1367_s30 = sshll.u32 (!%p194_p1), %s1922_s29, 9 }
  0x28   : > { %s200_s4 = scalar_lea.sflag (!%p194_p1), [#allocation3], %s1922_s29  ;;  %s1926_s5 = scalar_lea.vmem (!%p194_p1), [#allocation2], %s1367_s30 }
  0x2c   : > { %1683 = dma.done.wait (%p1887_p8), %s200_s4, 8192  }
  0x2d   : > { %1685 = vsyncadd (%p1887_p8), %s200_s4, 4294959104  ;;  %v1814_v0 = vmov 0   ;;  %v1933_v1 = vld [vmem:[%s1926_s5 + $0xe0] sm:$0xff]  ;;  %v1936_v2 = vld [vmem:[%s1926_s5 + $0xf0] sm:$0xff]  ;;  %s1369_s19 = sshll.u32 %s1800_s15, 9  ;;  %s1368_s21 = sshll.u32 %s1922_s29, 6 }
  0x2e   : > { %1528 = vset.pattern.permute.xlu0 %v1814_v0  ;;  %v1401_v3 = vcombine.high %v1933_v1, %v1936_v2  ;;  %v1941_v4 = vld [vmem:[%s1926_s5 + $0xe8] sm:$0xff]  ;;  %v1944_v5 = vld [vmem:[%s1926_s5 + $0xf8] sm:$0xff]  ;;  %v1947_v6 = vld [vmem:[%s1926_s5 + $0xc0] sm:$0xff]  ;;  %v1400_v9 = vcombine.low %v1933_v1, %v1936_v2  ;;  %s236_s22 = scalar_lea.vmem [#allocation5], %s1368_s21  ;;  %s2262_s4 = scalar_lea.hbm %s2315_s3, %s1369_s19 }
  0x2f   : > { %v1950_v7 = vld [vmem:[%s1926_s5 + $0xd0] sm:$0xff]  ;;  %v1403_v8 = vcombine.high %v1941_v4, %v1944_v5  ;;  %v1402_v10 = vcombine.low %v1941_v4, %v1944_v5  ;;  %v1959_v11 = vld [vmem:[%s1926_s5 + $0xc8] sm:$0xff]  ;;  %v1962_v12 = vld [vmem:[%s1926_s5 + $0xd8] sm:$0xff]  ;;  %s1243_s23 = sshll.u32 %s236_s22, 4  ;;  %s1227_s15 = scalar_lea.sflag [#allocation4], %s1922_s29  ;;  %s2264_s23 = int_to_ptr.vmem [resolvable:$true] %s1243_s23 }
  0x30   : > { %1058 = vmatprep.subr.bf16.mxu0 %v1401_v3  ;;  %v1397_v13 = vcombine.high %v1947_v6, %v1950_v7  ;;  %v1399_v14 = vcombine.high %v1959_v11, %v1962_v12  ;;  %v1969_v15 = vld [vmem:[%s1926_s5 + $0xa0] sm:$0xff]  ;;  %v1972_v16 = vld [vmem:[%s1926_s5 + $0xb0] sm:$0xff]  ;;  %v1396_v17 = vcombine.low %v1947_v6, %v1950_v7  ;;  %v1398_v18 = vcombine.low %v1959_v11, %v1962_v12  ;;  %v1979_v19 = vld [vmem:[%s1926_s5 + $0xa8] sm:$0xff]  ;;  %s1816_s24 = smov [#allocation5]  }
  0x31   : > { %1101 = vmatprep.subr.bf16.mxu1 %v1403_v8  ;;  %1059 = vmatpush1.bf16.msra.mxu0 %v1400_v9  ;;  %v1982_v20 = vld [vmem:[%s1926_s5 + $0xb8] sm:$0xff]  ;;  %v1393_v21 = vcombine.high %v1969_v15, %v1972_v16  ;;  %v1989_v23 = vld [vmem:[%s1926_s5 + $0x80] sm:$0xff]  ;;  %v1992_v24 = vld [vmem:[%s1926_s5 + $0x90] sm:$0xff]  ;;  %v1392_v25 = vcombine.low %v1969_v15, %v1972_v16  ;;  %s1636_s6 = sshll.u32 %s1816_s24, 4  ;;  %s1637_s6 = int_to_ptr.vmem [resolvable:$false] %s1636_s6 }
  0x32   : > { %1102 = vmatpush1.bf16.msra.mxu1 %v1402_v10  ;;  %1060 = vmatprep.subr.bf16.mxu0 %v1397_v13  ;;  %v1395_v22 = vcombine.high %v1979_v19, %v1982_v20  ;;  %v1394_v26 = vcombine.low %v1979_v19, %v1982_v20  ;;  %v1999_v27 = vld [vmem:[%s1926_s5 + $0x88] sm:$0xff]  ;;  %v2002_v28 = vld [vmem:[%s1926_s5 + $0x98] sm:$0xff]  ;;  %v1389_v29 = vcombine.high %v1989_v23, %v1992_v24  ;;  %v2009_v31 = vld [vmem:[%s1926_s5 + $0x60] sm:$0xff]  ;;  %s1638_s7 = scalar_lea.vmem %s1637_s6, 2048  ;;  %p1639_p2 = scmp.lt.s32.totalorder %s2264_s23, %s1637_s6 }
  0x33   : > { %1103 = vmatprep.subr.bf16.mxu1 %v1399_v14  ;;  %v1391_v30 = vcombine.high %v1999_v27, %v2002_v28  ;;  %v2012_v32 = vld [vmem:[%s1926_s5 + $0x70] sm:$0xff]  ;;  %v1388_v33 = vcombine.low %v1989_v23, %v1992_v24  ;;  %v1390_v34 = vcombine.low %v1999_v27, %v2002_v28  ;;  %v2019_v35 = vld [vmem:[%s1926_s5 + $0x68] sm:$0xff]  ;;  %v2022_v36 = vld [vmem:[%s1926_s5 + $0x78] sm:$0xff] }
  0x34   : > { %v1385_v37 = vcombine.high %v2009_v31, %v2012_v32  ;;  %v1595_v38 = vld [vmem:[%s2312_s0 + $0x4] ss:$8 sps:$4 sm:$0xff]   ;;  %v1387_v40 = vcombine.high %v2019_v35, %v2022_v36  ;;  %v264_v42 = vld [vmem:[%s1926_s5 + $0x50] sm:$0xff]  ;;  %v1384_v43 = vcombine.low %v2009_v31, %v2012_v32  ;;  %v1386_v44 = vcombine.low %v2019_v35, %v2022_v36  ;;  %v265_v47 = vld [vmem:[%s1926_s5 + $0x58] sm:$0xff] }
  0x35   : > { %1061 = vmatpush1.bf16.msra.mxu0 %v1396_v17  ;;  %v1178_v39 = vld [vmem:[%s2314_s2] sm:$0xff]  ;;  %1090 = vmatprep.mubr.bf16.mxu0 %v1595_v38  ;;  %v1179_v45 = vld [vmem:[%s2314_s2 + $0x8] sm:$0xff]  ;;  %v260_v51 = vld [vmem:[%s1926_s5 + $0x30] sm:$0xff] }
  0x36   : > { %1104 = vmatpush1.bf16.msra.mxu1 %v1398_v18  ;;  %1062 = vmatprep.subr.bf16.mxu0 %v1393_v21  ;;  %v262_v41 = vld [vmem:[%s1926_s5 + $0x40] sm:$0xff]  ;;  %v263_v46 = vld [vmem:[%s1926_s5 + $0x48] sm:$0xff]  ;;  %v261_v55 = vld [vmem:[%s1926_s5 + $0x38] sm:$0xff] }
  0x37   : > { %1105 = vmatprep.subr.bf16.mxu1 %v1395_v22  ;;  %1181 = vperm.xlu0 %1528, %v1178_v39   ;;  %v1381_v48 = vcombine.high %v262_v41, %v264_v42  ;;  %v1383_v49 = vcombine.high %v263_v46, %v265_v47  ;;  %v258_v50 = vld [vmem:[%s1926_s5 + $0x20] sm:$0xff]  ;;  %v1380_v52 = vcombine.low %v262_v41, %v264_v42  ;;  %v259_v54 = vld [vmem:[%s1926_s5 + $0x28] sm:$0xff]  ;;  %v256_v59 = vld [vmem:[%s1926_s5 + $0x10] sm:$0xff] }
  0x38   : > { %1133 = vmatprep.mubr.bf16.mxu1 %v1595_v38  ;;  %v1382_v53 = vcombine.low %v263_v46, %v265_v47  ;;  %v1377_v56 = vcombine.high %v258_v50, %v260_v51  ;;  %v1379_v57 = vcombine.high %v259_v54, %v261_v55  ;;  %v254_v58 = vld [vmem:[%s1926_s5] sm:$0xff]  ;;  %v1376_v60 = vcombine.low %v258_v50, %v260_v51  ;;  %v255_v62 = vld [vmem:[%s1926_s5 + $0x8] sm:$0xff]  ;;  %v257_v63 = vld [vmem:[%s1926_s5 + $0x18] sm:$0xff] }
  0x39   : > { %1063 = vmatpush1.bf16.msra.mxu0 %v1392_v25  ;;  %v1378_v61 = vcombine.low %v259_v54, %v261_v55  ;;  %v1373_v0 = vcombine.high %v254_v58, %v256_v59  ;;  %v1375_v3 = vcombine.high %v255_v62, %v257_v63  ;;  %1690 = vmul.bf16.f32.vacc0 %v254_v58, %v254_v58  ;;  %v2054_v10 = vld [vmem:[%s1926_s5 + $0x1e0] sm:$0xff]  ;;  %v2057_v13 = vld [vmem:[%s1926_s5 + $0x1f0] sm:$0xff]  ;;  %v2062_v17 = vld [vmem:[%s1926_s5 + $0x1e8] sm:$0xff] }
  0x3a   : > { %1106 = vmatpush1.bf16.msra.mxu1 %v1394_v26  ;;  %1064 = vmatprep.subr.bf16.mxu0 %v1389_v29  ;;  %1691 = vmac.bf16.f32.vacc0 %v256_v59, %v256_v59  ;;  %v1372_v8 = vcombine.low %v254_v58, %v256_v59  ;;  %v1374_v9 = vcombine.low %v255_v62, %v257_v63  ;;  %v2065_v18 = vld [vmem:[%s1926_s5 + $0x1f8] sm:$0xff]  ;;  %v2080_v26 = vld [vmem:[%s1926_s5 + $0x1c0] sm:$0xff]  ;;  %v2083_v29 = vld [vmem:[%s1926_s5 + $0x1d0] sm:$0xff] }
  0x3b   : > { %1107 = vmatprep.subr.bf16.mxu1 %v1391_v30  ;;  %1184 = vperm.xlu0 %1528, %v1179_v45   ;;  %1692 = vmac.bf16.f32.vacc0 %v258_v50, %v258_v50  ;;  %1738 = vmul.bf16.f32.vacc1 %v255_v62, %v255_v62  ;;  %v1433_v14 = vcombine.high %v2054_v10, %v2057_v13  ;;  %v2180_v38 = vld [vmem:[%s1926_s5 + $0x168] sm:$0xff]  ;;  %v2183_v39 = vld [vmem:[%s1926_s5 + $0x178] sm:$0xff]  ;;  %v290_v50 = vld [vmem:[%s1926_s5 + $0x120] sm:$0xff] }
  0x3c   : > { %1739 = vmac.bf16.f32.vacc1 %v257_v63, %v257_v63  ;;  %1693 = vmac.bf16.f32.vacc0 %v260_v51, %v260_v51  ;;  %v1435_v21 = vcombine.high %v2062_v17, %v2065_v18  ;;  %v1432_v22 = vcombine.low %v2054_v10, %v2057_v13  ;;  %v292_v51 = vld [vmem:[%s1926_s5 + $0x130] sm:$0xff]  ;;  %v286_v58 = vld [vmem:[%s1926_s5 + $0x100] sm:$0xff]  ;;  %v287_v62 = vld [vmem:[%s1926_s5 + $0x108] sm:$0xff] }
  0x3d   : > { %1065 = vmatpush1.bf16.msra.mxu0 %v1388_v33  ;;  %1740 = vmac.bf16.f32.vacc1 %v259_v54, %v259_v54  ;;  %1694 = vmac.bf16.f32.vacc0 %v262_v41, %v262_v41  ;;  %v1434_v25 = vcombine.low %v2062_v17, %v2065_v18  ;;  %v1429_v30 = vcombine.high %v2080_v26, %v2083_v29  ;;  %v291_v54 = vld [vmem:[%s1926_s5 + $0x128] sm:$0xff]  ;;  %v288_v59 = vld [vmem:[%s1926_s5 + $0x110] sm:$0xff] }
  0x3e   : > { %1108 = vmatpush1.bf16.msra.mxu1 %v1390_v34  ;;  %1066 = vmatprep.subr.bf16.mxu0 %v1385_v37  ;;  %1741 = vmac.bf16.f32.vacc1 %v261_v55, %v261_v55  ;;  %1695 = vmac.bf16.f32.vacc0 %v264_v42, %v264_v42  ;;  %v2170_v34 = vld [vmem:[%s1926_s5 + $0x160] sm:$0xff]  ;;  %v1419_v41 = vcombine.high %v2180_v38, %v2183_v39  ;;  %v293_v55 = vld [vmem:[%s1926_s5 + $0x138] sm:$0xff] }
  0x3f   : > { %1109 = vmatprep.subr.bf16.mxu1 %v1387_v40  ;;  %1742 = vmac.bf16.f32.vacc1 %v263_v46, %v263_v46  ;;  %1696 = vmac.bf16.f32.vacc0 %v2009_v31, %v2009_v31  ;;  %v2096_v31 = vld [vmem:[%s1926_s5 + $0x1c8] sm:$0xff]  ;;  %v294_v42 = vld [vmem:[%s1926_s5 + $0x140] sm:$0xff]  ;;  %v1418_v45 = vcombine.low %v2180_v38, %v2183_v39  ;;  %v1405_v63 = vcombine.high %v286_v58, %v288_v59 }
  0x40   : > { %1743 = vmac.bf16.f32.vacc1 %v265_v47, %v265_v47  ;;  %1697 = vmac.bf16.f32.vacc0 %v2012_v32, %v2012_v32  ;;  %v2099_v32 = vld [vmem:[%s1926_s5 + $0x1d8] sm:$0xff]  ;;  %v295_v46 = vld [vmem:[%s1926_s5 + $0x148] sm:$0xff] }
  0x41   : > { %1067 = vmatpush1.bf16.msra.mxu0 %v1384_v43  ;;  %1744 = vmac.bf16.f32.vacc1 %v2019_v35, %v2019_v35  ;;  %1698 = vmac.bf16.f32.vacc0 %v1989_v23, %v1989_v23  ;;  %v1431_v23 = vcombine.high %v2096_v31, %v2099_v32  ;;  %v2173_v35 = vld [vmem:[%s1926_s5 + $0x170] sm:$0xff]  ;;  %v297_v47 = vld [vmem:[%s1926_s5 + $0x158] sm:$0xff] }
  0x42   : > { %1110 = vmatpush1.bf16.msra.mxu1 %v1386_v44  ;;  %1068 = vmatprep.subr.bf16.mxu0 %v1381_v48  ;;  %1745 = vmac.bf16.f32.vacc1 %v2022_v36, %v2022_v36  ;;  %1699 = vmac.bf16.f32.vacc0 %v1992_v24, %v1992_v24  ;;  %v1428_v24 = vcombine.low %v2080_v26, %v2083_v29  ;;  %v296_v43 = vld [vmem:[%s1926_s5 + $0x150] sm:$0xff] }
  0x43   : > { %1111 = vmatprep.subr.bf16.mxu1 %v1383_v49  ;;  %1746 = vmac.bf16.f32.vacc1 %v1999_v27, %v1999_v27  ;;  %1700 = vmac.bf16.f32.vacc0 %v1969_v15, %v1969_v15  ;;  %v1430_v15 = vcombine.low %v2096_v31, %v2099_v32  ;;  %v2139_v27 = vld [vmem:[%s1926_s5 + $0x1b8] sm:$0xff]  ;;  %v1417_v40 = vcombine.high %v2170_v34, %v2173_v35 }
  0x44   : > { %1747 = vmac.bf16.f32.vacc1 %v2002_v28, %v2002_v28  ;;  %1701 = vmac.bf16.f32.vacc0 %v1972_v16, %v1972_v16  ;;  %v2120_v16 = vld [vmem:[%s1926_s5 + $0x1a0] sm:$0xff]  ;;  %v2163_v28 = vld [vmem:[%s1926_s5 + $0x198] sm:$0xff]  ;;  %v1416_v44 = vcombine.low %v2170_v34, %v2173_v35  ;;  %v1413_v48 = vcombine.high %v294_v42, %v296_v43 }
  0x45   : > { %1069 = vmatpush1.bf16.msra.mxu0 %v1380_v52  ;;  %1748 = vmac.bf16.f32.vacc1 %v1979_v19, %v1979_v19  ;;  %1702 = vmac.bf16.f32.vacc0 %v1947_v6, %v1947_v6  ;;  %v2123_v19 = vld [vmem:[%s1926_s5 + $0x1b0] sm:$0xff]  ;;  %v1415_v49 = vcombine.high %v295_v46, %v297_v47  ;;  %v1412_v52 = vcombine.low %v294_v42, %v296_v43 }
  0x46   : > { %1112 = vmatpush1.bf16.msra.mxu1 %v1382_v53  ;;  %1070 = vmatprep.subr.bf16.mxu0 %v1377_v56  ;;  %1749 = vmac.bf16.f32.vacc1 %v1982_v20, %v1982_v20  ;;  %1703 = vmac.bf16.f32.vacc0 %v1950_v7, %v1950_v7  ;;  %v1425_v6 = vcombine.high %v2120_v16, %v2123_v19  ;;  %v2136_v20 = vld [vmem:[%s1926_s5 + $0x1a8] sm:$0xff] }
  0x47   : > { %1113 = vmatprep.subr.bf16.mxu1 %v1379_v57  ;;  %1750 = vmac.bf16.f32.vacc1 %v1959_v11, %v1959_v11  ;;  %1704 = vmac.bf16.f32.vacc0 %v1933_v1, %v1933_v1  ;;  %v1427_v7 = vcombine.high %v2136_v20, %v2139_v27  ;;  %v2148_v1 = vld [vmem:[%s1926_s5 + $0x180] sm:$0xff]  ;;  %v2151_v11 = vld [vmem:[%s1926_s5 + $0x190] sm:$0xff]  ;;  %v1414_v53 = vcombine.low %v295_v46, %v297_v47 }
  0x48   : > { %1751 = vmac.bf16.f32.vacc1 %v1962_v12, %v1962_v12  ;;  %1705 = vmac.bf16.f32.vacc0 %v1936_v2, %v1936_v2  ;;  %v1424_v12 = vcombine.low %v2120_v16, %v2123_v19  ;;  %v1426_v2 = vcombine.low %v2136_v20, %v2139_v27 }
  0x49   : > { %1071 = vmatpush1.bf16.msra.mxu0 %v1376_v60  ;;  %1752 = vmac.bf16.f32.vacc1 %v1941_v4, %v1941_v4  ;;  %v2160_v4 = vld [vmem:[%s1926_s5 + $0x188] sm:$0xff]  ;;  %v1421_v33 = vcombine.high %v2148_v1, %v2151_v11  ;;  %v1420_v36 = vcombine.low %v2148_v1, %v2151_v11  ;;  %v1409_v56 = vcombine.high %v290_v50, %v292_v51 }
  0x4a   : > { %1114 = vmatpush1.bf16.msra.mxu1 %v1378_v61  ;;  %1072 = vmatprep.subr.bf16.mxu0 %v1373_v0  ;;  %1753 = vmac.bf16.f32.vacc1 %v1944_v5, %v1944_v5  ;;  %v1423_v5 = vcombine.high %v2160_v4, %v2163_v28  ;;  %v1422_v37 = vcombine.low %v2160_v4, %v2163_v28  ;;  %v289_v0 = vld [vmem:[%s1926_s5 + $0x118] sm:$0xff]  ;;  %s1632_s5 = scalar_lea.vmem %s2264_s23, 1024 }
  0x4b   : > { %1115 = vmatprep.subr.bf16.mxu1 %v1375_v3  ;;  %v1411_v57 = vcombine.high %v291_v54, %v293_v55  ;;  %v1408_v60 = vcombine.low %v290_v50, %v292_v51  ;;  %v1410_v61 = vcombine.low %v291_v54, %v293_v55  ;;  %1706 = vmac.bf16.f32.vacc0 %v286_v58, %v286_v58  ;;  %p1633_p8 = scmp.ne.s32.totalorder %s2264_s23, %s1632_s5  ;;  %p1640_p3 = scmp.lt.s32.totalorder %s1638_s7, %s1632_s5 }
  0x4c   : > { %v1407_v3 = vcombine.high %v287_v62, %v289_v0  ;;  %1707 = vmac.bf16.f32.vacc0 %v288_v59, %v288_v59  ;;  %1754 = vmac.bf16.f32.vacc1 %v287_v62, %v287_v62 }
  0x4d   : > { %1073 = vmatpush1.bf16.msra.mxu0 %v1372_v8  ;;  %v1404_v8 = vcombine.low %v286_v58, %v288_v59  ;;  %1708 = vmac.bf16.f32.vacc0 %v290_v50, %v290_v50  ;;  %1755 = vmac.bf16.f32.vacc1 %v289_v0, %v289_v0  ;;  %v1173_v50 = vstv %s1369_s19  ;;  %p1634_p12 = pnand %p1633_p8, %p1891_p9  ;;  %p1641_p5 = por %p1640_p3, %p1639_p2 }
  0x4e   : > { %1116 = vmatpush1.bf16.msra.mxu1 %v1374_v9  ;;  %1074 = vmatprep.subr.bf16.mxu0 %v1433_v14  ;;  %v1593_v9 = vld [vmem:[%s2312_s0] ss:$8 sps:$4 sm:$0xff]   ;;  %v1406_v14 = vcombine.low %v287_v62, %v289_v0  ;;  %1709 = vmac.bf16.f32.vacc0 %v292_v51, %v292_v51  ;;  %1756 = vmac.bf16.f32.vacc1 %v291_v54, %v291_v54 }
  0x4f   : > { %1117 = vmatprep.subr.bf16.mxu1 %v1435_v21  ;;  %1710 = vmac.bf16.f32.vacc0 %v294_v42, %v294_v42  ;;  %1757 = vmac.bf16.f32.vacc1 %v293_v55, %v293_v55  ;;  %p1635_p0 = pneg %p1634_p12 }
  0x50   : > { %1711 = vmac.bf16.f32.vacc0 %v296_v43, %v296_v43  ;;  %1758 = vmac.bf16.f32.vacc1 %v295_v46, %v295_v46 }
  0x51   : > { %1075 = vmatpush2.bf16.msra.mxu0 %v1432_v22  ;;  %1712 = vmac.bf16.f32.vacc0 %v2170_v34, %v2170_v34  ;;  %1759 = vmac.bf16.f32.vacc1 %v297_v47, %v297_v47  ;;  %p1642_p6 = pnand %p1641_p5, %p1635_p0 }
  0x52   : > { %1118 = vmatpush2.bf16.msra.mxu1 %v1434_v25  ;;  %1076 = vmatprep.subr.bf16.mxu0 %v1429_v30  ;;  %1713 = vmac.bf16.f32.vacc0 %v2173_v35, %v2173_v35  ;;  %1760 = vmac.bf16.f32.vacc1 %v2180_v38, %v2180_v38 }
  0x53   : > { %1119 = vmatprep.subr.bf16.mxu1 %v1431_v23  ;;  %1714 = vmac.bf16.f32.vacc0 %v2148_v1, %v2148_v1  ;;  %1761 = vmac.bf16.f32.vacc1 %v2183_v39, %v2183_v39  ;;  %v1815_v23 = vmov 1935823168  }
  0x54   : > { %1715 = vmac.bf16.f32.vacc0 %v2151_v11, %v2151_v11  ;;  %1762 = vmac.bf16.f32.vacc1 %v2160_v4, %v2160_v4 }
  0x55   : > { %1077 = vmatpush2.bf16.msra.mxu0 %v1428_v24  ;;  %1763 = vmac.bf16.f32.vacc1 %v2163_v28, %v2163_v28  ;;  %1716 = vmac.bf16.f32.vacc0 %v2120_v16, %v2120_v16  ;;  %v1726_v24 = vunpack.c.l.s4 %v1815_v23  ;;  %v1728_v16 = vlaneseq }
  0x56   : > { %1120 = vmatpush2.bf16.msra.mxu1 %v1430_v15  ;;  %1078 = vmatprep.subr.bf16.mxu0 %v1425_v6  ;;  %1717 = vmac.bf16.f32.vacc0 %v2123_v19, %v2123_v19  ;;  %1764 = vmac.bf16.f32.vacc1 %v2136_v20, %v2136_v20 }
  0x57   : > { %1121 = vmatprep.subr.bf16.mxu1 %v1427_v7  ;;  %1718 = vmac.bf16.f32.vacc0 %v2080_v26, %v2080_v26  ;;  %v1727_v15 = vunpack.c.0.s8 %v1726_v24  ;;  %v1729_v19 = vshrl.u32 %v1728_v16, 7  ;;  %1765 = vmac.bf16.f32.vacc1 %v2139_v27, %v2139_v27 }
  0x58   : > { %1719 = vmac.bf16.f32.vacc0 %v2083_v29, %v2083_v29  ;;  %1766 = vmac.bf16.f32.vacc1 %v2096_v31, %v2096_v31  ;;  %v1169_v47 = vand.u32 127, %v1728_v16 }
  0x59   : > { %1079 = vmatpush2.bf16.msra.mxu0 %v1424_v12  ;;  %1720 = vmac.bf16.f32.vacc0 %v2054_v10, %v2054_v10  ;;  %v1730_v6 = vsub.s32 %v1727_v15, %v1729_v19  ;;  %1767 = vmac.bf16.f32.vacc1 %v2099_v32, %v2099_v32 }
  0x5a   : > { %1122 = vmatpush2.bf16.msra.mxu1 %v1426_v2  ;;  %1080 = vmatprep.subr.bf16.mxu0 %v1421_v33  ;;  %1721 = vmac.bf16.f32.vacc0 %v2057_v13, %v2057_v13  ;;  %1768 = vmac.bf16.f32.vacc1 %v2062_v17, %v2062_v17 }
  0x5b   : > { %1123 = vmatprep.subr.bf16.mxu1 %v1423_v5  ;;  %1769 = vmac.bf16.f32.vacc1 %v2065_v18, %v2065_v18 }
  0x5c   : > { %v1722_v21 = vmovacc.add.low.vacc0 }
  0x5d   : > { %1081 = vmatpush2.bf16.msra.mxu0 %v1420_v36  ;;  %v1723_v22 = vmovacc.add.high.vacc0  ;;  %v1770_v10 = vmovacc.add.low.vacc1 }
  0x5e   : > { %1124 = vmatpush2.bf16.msra.mxu1 %v1422_v37  ;;  %1082 = vmatprep.subr.bf16.mxu0 %v1417_v40  ;;  %v1771_v13 = vmovacc.add.high.vacc1 }
  0x5f   : > { %1125 = vmatprep.subr.bf16.mxu1 %v1419_v41  ;;  %v1724_v25 = vcombine.low %v1722_v21, %v1723_v22  ;;  %v1725_v30 = vcombine.high %v1722_v21, %v1723_v22 }
  0x60   : > { %v1772_v29 = vcombine.low %v1770_v10, %v1771_v13  ;;  %v1773_v1 = vcombine.high %v1770_v10, %v1771_v13 }
  0x61   : > { %1083 = vmatpush2.bf16.msra.mxu0 %v1416_v44  ;;  %v1731_v26 = vrot.slane %v1724_v25, %v1730_v6  ;;  %v1737_v7 = vrot.slane %v1725_v30, %v1730_v6 }
  0x62   : > { %1126 = vmatpush2.bf16.msra.mxu1 %v1418_v45  ;;  %1084 = vmatprep.subr.bf16.mxu0 %v1413_v48  ;;  %v1779_v20 = vrot.slane %v1772_v29, %v1730_v6  ;;  %v1785_v11 = vrot.slane %v1773_v1, %v1730_v6  ;;  %v1171_v48 = vadd.s32 256, %v1169_v47 }
  0x63   : > { %1127 = vmatprep.subr.bf16.mxu1 %v1415_v49  ;;  %v605_v12 = vrot.slane %v1731_v26, 4  ;;  %v642_v2 = vrot.slane %v1737_v7, 4 }
  0x64   : > { %v679_v27 = vrot.slane %v1779_v20, 4  ;;  %v716_v31 = vrot.slane %v1785_v11, 4  ;;  %v1176_v58 = vadd.s32 %v1173_v50, %v1171_v48 }
  0x65   : > { %1085 = vmatpush2.bf16.msra.mxu0 %v1412_v52  ;;  %v606_v4 = vadd.f32 %v1731_v26, %v605_v12  ;;  %v643_v33 = vadd.f32 %v1737_v7, %v642_v2  ;;  %v1170_v52 = vadd.s32 128, %v1169_v47 }
  0x66   : > { %1128 = vmatpush2.bf16.msra.mxu1 %v1414_v53  ;;  %1086 = vmatprep.subr.bf16.mxu0 %v1409_v56  ;;  %v680_v28 = vadd.f32 %v1779_v20, %v679_v27  ;;  %v717_v5 = vadd.f32 %v1785_v11, %v716_v31  ;;  %v1172_v53 = vadd.s32 384, %v1169_v47 }
  0x67   : > { %1129 = vmatprep.subr.bf16.mxu1 %v1411_v57  ;;  %v607_v32 = vrot.slane %v606_v4, 2  ;;  %v644_v17 = vrot.slane %v643_v33, 2  ;;  %v1174_v57 = vadd.s32 %v1173_v50, %v1169_v47 }
  0x68   : > { %v681_v34 = vrot.slane %v680_v28, 2  ;;  %v718_v36 = vrot.slane %v717_v5, 2  ;;  %v1177_v0 = vadd.s32 %v1173_v50, %v1172_v53 }
  0x69   : > { %1087 = vmatpush2.bf16.msra.mxu0 %v1408_v60  ;;  %v608_v35 = vadd.f32 %v607_v32, %v606_v4  ;;  %v645_v37 = vadd.f32 %v644_v17, %v643_v33 }
  0x6a   : > { %1130 = vmatpush2.bf16.msra.mxu1 %v1410_v61  ;;  %1088 = vmatprep.subr.bf16.mxu0 %v1405_v63  ;;  %v682_v18 = vadd.f32 %v681_v34, %v680_v28  ;;  %v719_v39 = vadd.f32 %v718_v36, %v717_v5  ;;  %v1175_v63 = vadd.s32 %v1173_v50, %v1170_v52 }
  0x6b   : > { %1131 = vmatprep.subr.bf16.mxu1 %v1407_v3  ;;  %v609_v38 = vrot.slane %v608_v35, 1  ;;  %v646_v41 = vrot.slane %v645_v37, 1 }
  0x6c   : > { %v683_v40 = vrot.slane %v682_v18, 1  ;;  %v720_v43 = vrot.slane %v719_v39, 1 }
  0x6d   : > { %1089 = vmatpush2.bf16.msra.mxu0 %v1404_v8  ;;  %v610_v42 = vadd.f32 %v609_v38, %v608_v35  ;;  %v647_v45 = vadd.f32 %v646_v41, %v645_v37 }
  0x6e   : > { %1132 = vmatpush2.bf16.msra.mxu1 %v1406_v14  ;;  %v684_v44 = vadd.f32 %v683_v40, %v682_v18  ;;  %v721_v46 = vadd.f32 %v720_v43, %v719_v39 }
  0x6f   : > { %1596 = vrsqrt.f32 %v610_v42 }
  0x70   : > { %1091 = vmatmul.mubr.bf16.vlgmr.msra.gmra.mxu0 %v1593_v9  ;;  %1598 = vrsqrt.f32 %v684_v44 }
  0x71   : > { %1134 = vmatmul.mubr.bf16.vlgmr.msra.gmra.mxu1 %v1593_v9  ;;  %1600 = vrsqrt.f32 %v647_v45 }
  0x72   : > { %1602 = vrsqrt.f32 %v721_v46 }
  0x7c   : > { %v1597_v51 = vpop.eup %1596 }
  0x7d   : > { %v1599_v54 = vpop.eup %1598 }
  0x7e   : > { %v1601_v55 = vpop.eup %1600 }
  0x7f   : > { %v1603_v60 = vpop.eup %1602 }
  0xb2   : > { %v1182_v49 = vpop.permute.xlu0 %1181 }
  0xb3   : > { %vm1186_vm0 = vcmp.eq.s32.totalorder %v1182_v49, %v1174_v57  ;;  %vm1188_vm1 = vcmp.eq.s32.totalorder %v1182_v49, %v1176_v58  ;;  %vm1187_vm2 = vcmp.eq.s32.totalorder %v1182_v49, %v1175_v63  ;;  %vm1189_vm3 = vcmp.eq.s32.totalorder %v1182_v49, %v1177_v0 }
  0xb6   : > { %v1185_v14 = vpop.permute.xlu0 %1184 }
  0xb7   : > { %vm1190_vm4 = vcmp.eq.s32.totalorder %v1185_v14, %v1174_v57  ;;  %vm1192_vm5 = vcmp.eq.s32.totalorder %v1185_v14, %v1176_v58  ;;  %vm1191_vm6 = vcmp.eq.s32.totalorder %v1185_v14, %v1175_v63  ;;  %vm1193_vm7 = vcmp.eq.s32.totalorder %v1185_v14, %v1177_v0 }
 0x130   : > { %v1092_v56 = vpop.f32.mrf.mxu0 }
 0x131   : > { %v1144_v59 = vmul.f32 %v1597_v51, %v1092_v56  ;;  %v1135_v61 = vpop.f32.mrf.mxu1 }
 0x132   : > { %v1094_v62 = vpop.f32.mrf.mxu0  ;;  %v1146_v8 = vmul.f32 %v1599_v54, %v1135_v61 }
 0x133   : > { %v1436_v3 = vclamps-f32 %v1144_v59, 1.0  ;;  %v1145_v9 = vmul.f32 %v1601_v55, %v1094_v62  ;;  %v1137_v21 = vpop.f32.mrf.mxu1 }
 0x134   : > { %v1096_v22 = vpop.f32.mrf.mxu0  ;;  %v1438_v30 = vclamps-f32 %v1146_v8, 1.0  ;;  %v1147_v24 = vmul.f32 %v1603_v60, %v1137_v21 }
 0x135   : > { %v1444_v25 = vadd.f32 -0.35, %v1436_v3  ;;  %v1437_v23 = vclamps-f32 %v1145_v9, 1.0  ;;  %v1148_v15 = vmul.f32 %v1597_v51, %v1096_v22  ;;  %v1139_v16 = vpop.f32.mrf.mxu1 }
 0x136   : > { %v1098_v19 = vpop.f32.mrf.mxu0  ;;  %v1446_v6 = vadd.f32 -0.35, %v1438_v30  ;;  %v1439_v7 = vclamps-f32 %v1147_v24, 1.0  ;;  %v1150_v10 = vmul.f32 %v1599_v54, %v1139_v16 }
 0x137   : > { %v1445_v26 = vadd.f32 -0.35, %v1437_v23  ;;  %v1440_v13 = vclamps-f32 %v1148_v15, 1.0  ;;  %v1149_v29 = vmul.f32 %v1601_v55, %v1098_v19  ;;  %v1141_v1 = vpop.f32.mrf.mxu1  ;;  %v1202_v20 = vsel %vm1186_vm0, %v1444_v25, %v1436_v3 }
 0x138   : > { %v1447_v11 = vadd.f32 -0.35, %v1439_v7  ;;  %v1442_v12 = vclamps-f32 %v1150_v10, 1.0  ;;  %v1151_v27 = vmul.f32 %v1603_v60, %v1141_v1  ;;  %v1204_v28 = vsel %vm1188_vm1, %v1446_v6, %v1438_v30 }
 0x139   : > { %v1203_v2 = vsel %vm1187_vm2, %v1445_v26, %v1437_v23  ;;  %v1448_v4 = vadd.f32 -0.35, %v1440_v13  ;;  %v1441_v31 = vclamps-f32 %v1149_v29, 1.0  ;;  %v1210_v33 = vmul.f32 30.0, %v1202_v20 }
 0x13a   : > { %v1450_v32 = vadd.f32 -0.35, %v1442_v12  ;;  %v1443_v5 = vclamps-f32 %v1151_v27, 1.0  ;;  %v1205_v34 = vsel %vm1189_vm3, %v1447_v11, %v1439_v7  ;;  %v1211_v17 = vmul.f32 30.0, %v1203_v2 }
 0x13b   : > { %v1449_v35 = vadd.f32 -0.35, %v1441_v31  ;;  %v1206_v36 = vsel %vm1190_vm4, %v1448_v4, %v1440_v13  ;;  %v1212_v18 = vmul.f32 30.0, %v1204_v28  ;;  %v1213_v37 = vmul.f32 30.0, %v1205_v34  ;;  %1218 = vst [vmem:[%s236_s22] sm:$0xff] %v1210_v33 }
 0x13c   : > { %v1451_v38 = vadd.f32 -0.35, %v1443_v5  ;;  %v1208_v39 = vsel %vm1192_vm5, %v1450_v32, %v1442_v12  ;;  %v1214_v40 = vmul.f32 30.0, %v1206_v36  ;;  %1219 = vst [vmem:[%s236_s22 + $0x8] sm:$0xff] %v1211_v17 }
 0x13d   : > { %v1207_v41 = vsel %vm1191_vm6, %v1449_v35, %v1441_v31  ;;  %v1216_v42 = vmul.f32 30.0, %v1208_v39  ;;  %1220 = vst [vmem:[%s236_s22 + $0x10] sm:$0xff] %v1212_v18  ;;  %1221 = vst [vmem:[%s236_s22 + $0x18] sm:$0xff] %v1213_v37 }
 0x13e   : > { %v1209_v43 = vsel %vm1193_vm7, %v1451_v38, %v1443_v5  ;;  %v1215_v44 = vmul.f32 30.0, %v1207_v41  ;;  %1222 = vst [vmem:[%s236_s22 + $0x20] sm:$0xff] %v1214_v40 }
 0x13f   : > { %v1217_v45 = vmul.f32 30.0, %v1209_v43  ;;  %1224 = vst [vmem:[%s236_s22 + $0x30] sm:$0xff] %v1216_v42 }
 0x140   : > { %1223 = vst [vmem:[%s236_s22 + $0x28] sm:$0xff] %v1215_v44 }
 0x141   : > { %1225 = vst [vmem:[%s236_s22 + $0x38] sm:$0xff] %v1217_v45 }
 0x142   : > { %1645 = shalt.err (!%p1642_p6)
}
 0x143   : > { %s1646_s8 = scalar_lea.hbm %s2262_s4, 1024  ;;  %s1650_s11 = scalar_lea.hbm %s2315_s3, 2048 }
 0x144   : > { %p1647_p7 = scmp.ne.s32.totalorder %s2262_s4, %s1646_s8  ;;  %p1651_p13 = scmp.lt.s32.totalorder %s2262_s4, %s2315_s3 }
 0x145   : > { %p1652_p1 = scmp.lt.s32.totalorder %s1650_s11, %s1646_s8 }
 0x146   : > { %p1648_p10 = pnand %p1647_p7, %p1891_p9 }
 0x147   : > { %p1653_p8 = por %p1652_p1, %p1651_p13 }
 0x148   : > { %p1649_p4 = pneg %p1648_p10 }
 0x14a   : > { %p1654_p12 = pnand %p1653_p8, %p1649_p4 }
 0x14c   : > { %1657 = shalt.err (!%p1654_p12)
}
 0x14d   : > { %s1817_s21 = smov 512   ;;  %s1818_s22 = smov 1024  }
 0x14e   : > { %s1819_s28 = smov 32  }
 0x14f   : > { %1461 = dma.vmem_to_hbm [thread:$0]  (%p1891_p9), %s2264_s23, 1024, %s2262_s4, %s1227_s15, %s1817_s21, %s1818_s22, %s1819_s28  }
 0x150 PF: > { %s1258_s30 = sand.u32 1, %s1788_s12   ;;  %p2321_p0 = scmp.ge.s32.totalorder %s1808_s17, 2 }
 0x151   : > { %s1259_s5 = scalar_lea.sflag [#allocation4], %s1258_s30 }
 0x152   : > { %p1468_p2 = pnand %p2321_p0, %p1898_p11 }
 0x154   : > { %p1469_p3 = pneg %p1468_p2 }
 0x156   : > { %1687 = dma.done.wait (%p1469_p3), %s1259_s5, 1024  }
 0x157   : > { %1689 = vsyncadd (%p1469_p3), %s1259_s5, 4294966272  ;;  %s19_s17 = sadd.s32 1, %s1808_s17   ;;  %s2322_s12 = smov %s1792_s13 }
 0x158   : > { %p16_p5 = scmp.ge.s32.totalorder %s19_s17, 4   ;;  %s2323_s13 = smov %s1796_s14 }
 0x159   : > { %s2324_s14 = smov %s1896_s26  ;;  %s2325_s15 = smov %s1804_s16 }
 0x15a   : > { %s2326_s16 = smov %s2328_s20  ;;  %18 = sbr.rel (!%p16_p5) target bundleno = 6 (0x6), region = 83 }
 0x15f   :  { %1264 = vsyncpa [#allocation3], 1 }
 0x160   :  { %1266 = vsyncpa [#allocation3 + $0x1], 1 }
 0x161   :  { %1267 = vsyncpa [#allocation4], 1 }
 0x162   :  { %1269 = vsyncpa [#allocation4 + $0x1], 1 }

</bundles_post_ra>
